<compile_context>
chip_gen: v5e
topology: v5e:2x2
jax: 0.10.0
libtpu: 0.0.40
codegen_flags: <defaults>
</compile_context>

<pallas_src>
import functools

import jax
import jax.numpy as jnp
from jax.experimental import pallas as pl
from jax.experimental.pallas import tpu as pltpu


# ---------------------------------------------------------------------------
# Fused kernel: one batch element per grid step.
#   query branch :  q_pool = max_L tanh(tanh(q @ Wc + bc) @ Wl + bl)
#   product branch: d_pool = max_L tanh(tanh(d @ Wc + bc) @ Wl + bl)  (all docs
#                   batched into one matmul)
#   epilogue      : cosine similarity between q_pool and each doc's d_pool
# ---------------------------------------------------------------------------
def _cpsir_fused_kernel(q_ref, d_ref,
                        qwc_ref, qbc_ref, qwl_ref, qbl_ref,
                        pwc_ref, pbc_ref, pwl_ref, pbl_ref,
                        o_ref, *, num_docs, dlen):
    # q_ref: (1, Lq, C)   d_ref: (1, num_docs*dlen, C)
    # *_wc: (C, H)  *_bc: (1, H)  *_wl: (H, T)  *_bl: (1, T)
    # o_ref: (1, num_docs, 1)
    eps = 1e-8

    # ----- query branch -----
    q = q_ref[0]                                                       # (Lq, C)
    qh = jnp.tanh(jnp.dot(q, qwc_ref[...],
                          preferred_element_type=jnp.float32) + qbc_ref[...])
    qt = jnp.tanh(jnp.dot(qh, qwl_ref[...],
                          preferred_element_type=jnp.float32) + qbl_ref[...])
    q_pool = jnp.max(qt, axis=0, keepdims=True)                        # (1, T)

    # ----- product branch: every doc of this batch element in one matmul -----
    d = d_ref[0]                                                       # (D*Ld, C)
    dh = jnp.tanh(jnp.dot(d, pwc_ref[...],
                          preferred_element_type=jnp.float32) + pbc_ref[...])
    dt = jnp.tanh(jnp.dot(dh, pwl_ref[...],
                          preferred_element_type=jnp.float32) + pbl_ref[...])
    T = dt.shape[-1]
    # dlen == sublane tile (8) here, so this split reshape is layout-preserving.
    d_pool = jnp.max(dt.reshape(num_docs, dlen, T), axis=1)            # (D, T)

    # ----- cosine similarity epilogue (PyTorch semantics, eps = 1e-8) -----
    dots = jnp.sum(q_pool * d_pool, axis=-1, keepdims=True)            # (D, 1)
    pn = jnp.sqrt(jnp.sum(d_pool * d_pool, axis=-1, keepdims=True))    # (D, 1)
    qn = jnp.sqrt(jnp.sum(q_pool * q_pool, axis=-1, keepdims=True))    # (1, 1)
    denom = jnp.maximum(pn, eps) * jnp.maximum(qn, eps)                # (D, 1)
    o_ref[...] = (dots / denom)[None]                                  # (1, D, 1)


def cpsir_forward(q_emb, d_emb,
                  q_wc, q_bc, q_wl, q_bl,
                  p_wc, p_bc, p_wl, p_bl):
    """q_emb: (B, Lq, C); d_emb: (B, num_docs, Ld, C) -> scores (B, num_docs)."""
    B, Lq, C = q_emb.shape
    _, D, Ld, _ = d_emb.shape
    H = q_wc.shape[1]
    T = q_wl.shape[1]
    # Free wrapper reshape: lets the kernel run one (D*Ld, C) matmul per batch.
    d_flat = d_emb.reshape(B, D * Ld, C)

    kernel = functools.partial(_cpsir_fused_kernel, num_docs=D, dlen=Ld)
    const2 = lambda b: (0, 0)   # weights/biases stay VMEM-resident across grid

    out = pl.pallas_call(
        kernel,
        out_shape=jax.ShapeDtypeStruct((B, D, 1), jnp.float32),
        grid_spec=pltpu.PrefetchScalarGridSpec(
            num_scalar_prefetch=0,
            grid=(B,),
            in_specs=[
                pl.BlockSpec((1, Lq, C), lambda b: (b, 0, 0)),
                pl.BlockSpec((1, D * Ld, C), lambda b: (b, 0, 0)),
                pl.BlockSpec((C, H), const2),
                pl.BlockSpec((1, H), const2),
                pl.BlockSpec((H, T), const2),
                pl.BlockSpec((1, T), const2),
                pl.BlockSpec((C, H), const2),
                pl.BlockSpec((1, H), const2),
                pl.BlockSpec((H, T), const2),
                pl.BlockSpec((1, T), const2),
            ],
            out_specs=pl.BlockSpec((1, D, 1), lambda b: (b, 0, 0)),
        ),
        compiler_params=pltpu.CompilerParams(
            dimension_semantics=("parallel",)),
    )(q_emb, d_flat, q_wc, q_bc, q_wl, q_bl, p_wc, p_bc, p_wl, p_bl)
    return out[:, :, 0]


# ---------------------------------------------------------------------------
# CPSIR module (parameters + JAX glue; the entire hot path is one pallas_call)
# ---------------------------------------------------------------------------
class CPSIRPallas:
    def __init__(self, embedding_dim, hidden_dim, vocab_size, tagset_size,
                 dropout=0.2, window=1, kernel_size=1, batch_size=1, *, key):
        assert kernel_size == 1, "Pallas implementation covers kernel_size=1 (the default)"
        self.window = window
        self.batch_size = batch_size
        E, H, V, T = embedding_dim, hidden_dim, vocab_size, tagset_size
        cin = window * E
        ks = jax.random.split(key, 9)

        emb = 0.1 * jax.random.normal(ks[0], (V, E), jnp.float32)
        self.embedding = emb.at[1].set(0.0)   # padding_idx=1 row is zero (nn.Embedding)

        kconv = 1.0 / (cin * kernel_size) ** 0.5
        klin = 1.0 / hidden_dim ** 0.5
        self.q_wc = jax.random.uniform(ks[1], (cin, H), jnp.float32, -kconv, kconv)
        self.q_bc = jax.random.uniform(ks[2], (1, H), jnp.float32, -kconv, kconv)
        self.q_wl = jax.random.uniform(ks[3], (H, T), jnp.float32, -klin, klin)
        self.q_bl = jax.random.uniform(ks[4], (1, T), jnp.float32, -klin, klin)
        self.p_wc = jax.random.uniform(ks[5], (cin, H), jnp.float32, -kconv, kconv)
        self.p_bc = jax.random.uniform(ks[6], (1, H), jnp.float32, -kconv, kconv)
        self.p_wl = jax.random.uniform(ks[7], (H, T), jnp.float32, -klin, klin)
        self.p_bl = jax.random.uniform(ks[8], (1, T), jnp.float32, -klin, klin)

    def sliding_window(self, seq):
        # seq: (N, L, E) -> (N, L - window + 1, window * E)
        L = seq.shape[1]
        assert L >= self.window
        offset = L - self.window + 1
        parts = [seq[:, i:offset + i, :] for i in range(self.window)]
        return jnp.concatenate(parts, axis=-1)

    def __call__(self, queries, products):
        # queries: (qlen,) int32 token ids; products: (num_docs, dlen) int32 token ids
        queries = queries.reshape(self.batch_size, queries.shape[0])
        products = products.reshape(self.batch_size, products.shape[0], products.shape[1])
        B = queries.shape[0]
        num_docs, dlen = products.shape[1], products.shape[2]

        # Embedding gather + sliding-window concat stay in plain JAX (no
        # profitable Pallas form at these sizes).
        # TODO(synk): Dropout treated as identity (inference); PyTorch training-mode
        # dropout RNG cannot be reproduced bit-exactly.
        q_emb = jnp.take(self.embedding, queries, axis=0)        # (B, qlen, E)
        q_emb = self.sliding_window(q_emb)                       # (B, Lq, window*E)

        d_ids = products.reshape(B * num_docs, dlen)
        d_emb = jnp.take(self.embedding, d_ids, axis=0)          # (B*D, dlen, E)
        d_emb = self.sliding_window(d_emb)                       # (B*D, Ld, window*E)
        Ld, C = d_emb.shape[1], d_emb.shape[2]
        d_emb = d_emb.reshape(B, num_docs, Ld, C)

        # Single fused Pallas launch: both rep branches + cosine epilogue.
        return cpsir_forward(q_emb, d_emb,
                             self.q_wc, self.q_bc, self.q_wl, self.q_bl,
                             self.p_wc, self.p_bc, self.p_wl, self.p_bl)


if __name__ == "__main__":
    key = jax.random.PRNGKey(0)
    k_model, k_q, k_p = jax.random.split(key, 3)

    embedding_dim, hidden_dim, vocab_size, tagset_size = 32, 32, 100, 16
    model = CPSIRPallas(embedding_dim, hidden_dim, vocab_size, tagset_size,
                        dropout=0.2, window=1, kernel_size=1, batch_size=1, key=k_model)

    qlen, num_docs, dlen = 8, 4, 8
    queries = jax.random.randint(k_q, (qlen,), 0, vocab_size, dtype=jnp.int32)
    products = jax.random.randint(k_p, (num_docs, dlen), 0, vocab_size, dtype=jnp.int32)

    fwd = jax.jit(model.__call__)
    out = fwd(queries, products)
    jax.block_until_ready(out)
    assert out.shape == (1, num_docs), out.shape
    assert bool(jnp.all(jnp.isfinite(out)))
    print("KERNEL_OK")
</pallas_src>

<mosaic_0001>
module attributes {stable_mosaic.version = 11 : i64} {
  func.func @_cpsir_fused_kernel(%arg0: i32, %arg1: memref<1x8x32xf32, #tpu.memory_space<vmem>>, %arg2: memref<1x32x32xf32, #tpu.memory_space<vmem>>, %arg3: memref<32x32xf32, #tpu.memory_space<vmem>>, %arg4: memref<1x32xf32, #tpu.memory_space<vmem>>, %arg5: memref<32x16xf32, #tpu.memory_space<vmem>>, %arg6: memref<1x16xf32, #tpu.memory_space<vmem>>, %arg7: memref<32x32xf32, #tpu.memory_space<vmem>>, %arg8: memref<1x32xf32, #tpu.memory_space<vmem>>, %arg9: memref<32x16xf32, #tpu.memory_space<vmem>>, %arg10: memref<1x16xf32, #tpu.memory_space<vmem>>, %arg11: memref<1x4x1xf32, #tpu.memory_space<vmem>>) attributes {dimension_semantics = [#tpu.dimension_semantics<parallel>], iteration_bounds = array<i64: 1>, scalar_prefetch = 0 : i64, scratch_operands = 0 : i64, tpu.core_type = #tpu.core_type<tc>, window_params = [{transform_indices = @transform_0, window_bounds = array<i64: 1, 8, 32>}, {transform_indices = @transform_1, window_bounds = array<i64: 1, 32, 32>}, {pipeline_mode = #tpu.pipeline_mode<synchronous>, transform_indices = @transform_2, window_bounds = array<i64: 32, 32>}, {pipeline_mode = #tpu.pipeline_mode<synchronous>, transform_indices = @transform_3, window_bounds = array<i64: 1, 32>}, {pipeline_mode = #tpu.pipeline_mode<synchronous>, transform_indices = @transform_4, window_bounds = array<i64: 32, 16>}, {pipeline_mode = #tpu.pipeline_mode<synchronous>, transform_indices = @transform_5, window_bounds = array<i64: 1, 16>}, {pipeline_mode = #tpu.pipeline_mode<synchronous>, transform_indices = @transform_6, window_bounds = array<i64: 32, 32>}, {pipeline_mode = #tpu.pipeline_mode<synchronous>, transform_indices = @transform_7, window_bounds = array<i64: 1, 32>}, {pipeline_mode = #tpu.pipeline_mode<synchronous>, transform_indices = @transform_8, window_bounds = array<i64: 32, 16>}, {pipeline_mode = #tpu.pipeline_mode<synchronous>, transform_indices = @transform_9, window_bounds = array<i64: 1, 16>}, {transform_indices = @transform_10, window_bounds = array<i64: 1, 4, 1>}]} {
    %c0 = arith.constant 0 : index
    %c0_0 = arith.constant 0 : index
    %c0_1 = arith.constant 0 : index
    %0 = vector.load %arg1[%c0, %c0_0, %c0_1] : memref<1x8x32xf32, #tpu.memory_space<vmem>>, vector<1x8x32xf32>
    %1 = vector.shape_cast %0 : vector<1x8x32xf32> to vector<8x32xf32>
    %c0_2 = arith.constant 0 : index
    %c0_3 = arith.constant 0 : index
    %2 = vector.load %arg3[%c0_2, %c0_3] : memref<32x32xf32, #tpu.memory_space<vmem>>, vector<32x32xf32>
    %cst = arith.constant dense<0.000000e+00> : vector<8x32xf32>
    %3 = tpu.matmul %1, %2, %cst {dimension_numbers = #tpu.dot_dimension_numbers<[1], [0], [0], [1], [0, 0, 1, 1], [], []>} : vector<8x32xf32>, vector<32x32xf32>, vector<8x32xf32> -> vector<8x32xf32>
    %c0_4 = arith.constant 0 : index
    %c0_5 = arith.constant 0 : index
    %4 = vector.load %arg4[%c0_4, %c0_5] : memref<1x32xf32, #tpu.memory_space<vmem>>, vector<1x32xf32>
    %5 = vector.broadcast %4 : vector<1x32xf32> to vector<8x32xf32>
    %6 = arith.addf %3, %5 : vector<8x32xf32>
    %7 = math.tanh %6 : vector<8x32xf32>
    %c0_6 = arith.constant 0 : index
    %c0_7 = arith.constant 0 : index
    %8 = vector.load %arg5[%c0_6, %c0_7] : memref<32x16xf32, #tpu.memory_space<vmem>>, vector<32x16xf32>
    %cst_8 = arith.constant dense<0.000000e+00> : vector<8x16xf32>
    %9 = tpu.matmul %7, %8, %cst_8 {dimension_numbers = #tpu.dot_dimension_numbers<[1], [0], [0], [1], [0, 0, 1, 1], [], []>} : vector<8x32xf32>, vector<32x16xf32>, vector<8x16xf32> -> vector<8x16xf32>
    %c0_9 = arith.constant 0 : index
    %c0_10 = arith.constant 0 : index
    %10 = vector.load %arg6[%c0_9, %c0_10] : memref<1x16xf32, #tpu.memory_space<vmem>>, vector<1x16xf32>
    %11 = vector.broadcast %10 : vector<1x16xf32> to vector<8x16xf32>
    %12 = arith.addf %9, %11 : vector<8x16xf32>
    %13 = math.tanh %12 : vector<8x16xf32>
    %cst_11 = arith.constant dense<0xFF800000> : vector<16xf32>
    %14 = vector.multi_reduction <maximumf>, %13, %cst_11 [0] : vector<8x16xf32> to vector<16xf32>
    %15 = vector.shape_cast %14 : vector<16xf32> to vector<1x16xf32>
    %c0_12 = arith.constant 0 : index
    %c0_13 = arith.constant 0 : index
    %c0_14 = arith.constant 0 : index
    %16 = vector.load %arg2[%c0_12, %c0_13, %c0_14] : memref<1x32x32xf32, #tpu.memory_space<vmem>>, vector<1x32x32xf32>
    %17 = vector.shape_cast %16 : vector<1x32x32xf32> to vector<32x32xf32>
    %c0_15 = arith.constant 0 : index
    %c0_16 = arith.constant 0 : index
    %18 = vector.load %arg7[%c0_15, %c0_16] : memref<32x32xf32, #tpu.memory_space<vmem>>, vector<32x32xf32>
    %cst_17 = arith.constant dense<0.000000e+00> : vector<32x32xf32>
    %19 = tpu.matmul %17, %18, %cst_17 {dimension_numbers = #tpu.dot_dimension_numbers<[1], [0], [0], [1], [0, 0, 1, 1], [], []>} : vector<32x32xf32>, vector<32x32xf32>, vector<32x32xf32> -> vector<32x32xf32>
    %c0_18 = arith.constant 0 : index
    %c0_19 = arith.constant 0 : index
    %20 = vector.load %arg8[%c0_18, %c0_19] : memref<1x32xf32, #tpu.memory_space<vmem>>, vector<1x32xf32>
    %21 = vector.broadcast %20 : vector<1x32xf32> to vector<32x32xf32>
    %22 = arith.addf %19, %21 : vector<32x32xf32>
    %23 = math.tanh %22 : vector<32x32xf32>
    %c0_20 = arith.constant 0 : index
    %c0_21 = arith.constant 0 : index
    %24 = vector.load %arg9[%c0_20, %c0_21] : memref<32x16xf32, #tpu.memory_space<vmem>>, vector<32x16xf32>
    %cst_22 = arith.constant dense<0.000000e+00> : vector<32x16xf32>
    %25 = tpu.matmul %23, %24, %cst_22 {dimension_numbers = #tpu.dot_dimension_numbers<[1], [0], [0], [1], [0, 0, 1, 1], [], []>} : vector<32x32xf32>, vector<32x16xf32>, vector<32x16xf32> -> vector<32x16xf32>
    %c0_23 = arith.constant 0 : index
    %c0_24 = arith.constant 0 : index
    %26 = vector.load %arg10[%c0_23, %c0_24] : memref<1x16xf32, #tpu.memory_space<vmem>>, vector<1x16xf32>
    %27 = vector.broadcast %26 : vector<1x16xf32> to vector<32x16xf32>
    %28 = arith.addf %25, %27 : vector<32x16xf32>
    %29 = math.tanh %28 : vector<32x16xf32>
    %30 = vector.shape_cast %29 : vector<32x16xf32> to vector<4x8x16xf32>
    %cst_25 = arith.constant dense<0xFF800000> : vector<4x16xf32>
    %31 = vector.multi_reduction <maximumf>, %30, %cst_25 [1] : vector<4x8x16xf32> to vector<4x16xf32>
    %32 = vector.broadcast %15 : vector<1x16xf32> to vector<4x16xf32>
    %33 = arith.mulf %32, %31 : vector<4x16xf32>
    %cst_26 = arith.constant dense<0.000000e+00> : vector<4xf32>
    %34 = vector.multi_reduction <add>, %33, %cst_26 [1] : vector<4x16xf32> to vector<4xf32>
    %35 = vector.shape_cast %34 : vector<4xf32> to vector<4x1xf32>
    %36 = arith.mulf %31, %31 : vector<4x16xf32>
    %cst_27 = arith.constant dense<0.000000e+00> : vector<4xf32>
    %37 = vector.multi_reduction <add>, %36, %cst_27 [1] : vector<4x16xf32> to vector<4xf32>
    %38 = vector.shape_cast %37 : vector<4xf32> to vector<4x1xf32>
    %39 = math.sqrt %38 : vector<4x1xf32>
    %40 = arith.mulf %15, %15 : vector<1x16xf32>
    %cst_28 = arith.constant dense<0.000000e+00> : vector<1xf32>
    %41 = vector.multi_reduction <add>, %40, %cst_28 [1] : vector<1x16xf32> to vector<1xf32>
    %42 = vector.shape_cast %41 : vector<1xf32> to vector<1x1xf32>
    %43 = math.sqrt %42 : vector<1x1xf32>
    %cst_29 = arith.constant 9.99999993E-9 : f32
    %44 = vector.broadcast %cst_29 : f32 to vector<4x1xf32>
    %45 = arith.maximumf %39, %44 : vector<4x1xf32>
    %cst_30 = arith.constant 9.99999993E-9 : f32
    %46 = vector.broadcast %cst_30 : f32 to vector<1x1xf32>
    %47 = arith.maximumf %43, %46 : vector<1x1xf32>
    %48 = vector.broadcast %47 : vector<1x1xf32> to vector<4x1xf32>
    %49 = arith.mulf %45, %48 : vector<4x1xf32>
    %50 = arith.divf %35, %49 : vector<4x1xf32>
    %51 = vector.shape_cast %50 : vector<4x1xf32> to vector<1x4x1xf32>
    %c0_31 = arith.constant 0 : index
    %c0_32 = arith.constant 0 : index
    %c0_33 = arith.constant 0 : index
    %52 = vector.load %arg11[%c0_31, %c0_32, %c0_33] : memref<1x4x1xf32, #tpu.memory_space<vmem>>, vector<1x4x1xf32>
    tpu.vector_store %arg11[%c0_31, %c0_32, %c0_33], %51 {strides = array<i32>} : memref<1x4x1xf32, #tpu.memory_space<vmem>>, vector<1x4x1xf32>,
    return
  }
  func.func @transform_0(%arg0: i32) -> (i32, i32, i32) {
    %c0_i32 = arith.constant 0 : i32
    %c0_i32_0 = arith.constant 0 : i32
    %c0_i32_1 = arith.constant 0 : i32
    return %arg0, %c0_i32, %c0_i32_0 : i32, i32, i32
  }
  func.func @transform_1(%arg0: i32) -> (i32, i32, i32) {
    %c0_i32 = arith.constant 0 : i32
    %c0_i32_0 = arith.constant 0 : i32
    %c0_i32_1 = arith.constant 0 : i32
    return %arg0, %c0_i32, %c0_i32_0 : i32, i32, i32
  }
  func.func @transform_2(%arg0: i32) -> (i32, i32) {
    %c0_i32 = arith.constant 0 : i32
    %c0_i32_0 = arith.constant 0 : i32
    %c0_i32_1 = arith.constant 0 : i32
    return %c0_i32, %c0_i32_0 : i32, i32
  }
  func.func @transform_3(%arg0: i32) -> (i32, i32) {
    %c0_i32 = arith.constant 0 : i32
    %c0_i32_0 = arith.constant 0 : i32
    %c0_i32_1 = arith.constant 0 : i32
    return %c0_i32, %c0_i32_0 : i32, i32
  }
  func.func @transform_4(%arg0: i32) -> (i32, i32) {
    %c0_i32 = arith.constant 0 : i32
    %c0_i32_0 = arith.constant 0 : i32
    %c0_i32_1 = arith.constant 0 : i32
    return %c0_i32, %c0_i32_0 : i32, i32
  }
  func.func @transform_5(%arg0: i32) -> (i32, i32) {
    %c0_i32 = arith.constant 0 : i32
    %c0_i32_0 = arith.constant 0 : i32
    %c0_i32_1 = arith.constant 0 : i32
    return %c0_i32, %c0_i32_0 : i32, i32
  }
  func.func @transform_6(%arg0: i32) -> (i32, i32) {
    %c0_i32 = arith.constant 0 : i32
    %c0_i32_0 = arith.constant 0 : i32
    %c0_i32_1 = arith.constant 0 : i32
    return %c0_i32, %c0_i32_0 : i32, i32
  }
  func.func @transform_7(%arg0: i32) -> (i32, i32) {
    %c0_i32 = arith.constant 0 : i32
    %c0_i32_0 = arith.constant 0 : i32
    %c0_i32_1 = arith.constant 0 : i32
    return %c0_i32, %c0_i32_0 : i32, i32
  }
  func.func @transform_8(%arg0: i32) -> (i32, i32) {
    %c0_i32 = arith.constant 0 : i32
    %c0_i32_0 = arith.constant 0 : i32
    %c0_i32_1 = arith.constant 0 : i32
    return %c0_i32, %c0_i32_0 : i32, i32
  }
  func.func @transform_9(%arg0: i32) -> (i32, i32) {
    %c0_i32 = arith.constant 0 : i32
    %c0_i32_0 = arith.constant 0 : i32
    %c0_i32_1 = arith.constant 0 : i32
    return %c0_i32, %c0_i32_0 : i32, i32
  }
  func.func @transform_10(%arg0: i32) -> (i32, i32, i32) {
    %c0_i32 = arith.constant 0 : i32
    %c0_i32_0 = arith.constant 0 : i32
    %c0_i32_1 = arith.constant 0 : i32
    return %arg0, %c0_i32, %c0_i32_0 : i32, i32, i32
  }
}

</mosaic_0001>

<bundles_post_ra>
// kernel: a_call__.1
= control target key start
LH: loop header
LB: loop body
LE: loop exit
PB: predicated region body
PF: predicated region fallthrough
CT: control target
= control target key end

     0   :  { %vm44_vm0 = vcmask 261120   ;;  %vm101_vm1 = vcmask 130048   ;;  %vm251_vm2 = vcmask 1041409   ;;  %vm253_vm3 = vcmask 1042434   ;;  %s527_s6 = inlined_call_operand.vmem [shape: f32[32,32], index: 6, kind: input, shape index: {}]   ;;  %s528_s2 = inlined_call_operand.vmem [shape: f32[32,32], index: 2, kind: input, shape index: {}]   ;;  %s529_s1 = inlined_call_operand.vmem [shape: f32[1,32,32], index: 1, kind: input, shape index: {}]   ;;  %s530_s0 = inlined_call_operand.vmem [shape: f32[1,8,32], index: 0, kind: input, shape index: {}]   ;;  %s531_s3 = inlined_call_operand.vmem [shape: f32[1,32], index: 3, kind: input, shape index: {}]   ;;  %s532_s7 = inlined_call_operand.vmem [shape: f32[1,32], index: 7, kind: input, shape index: {}]   ;;  %s533_s5 = inlined_call_operand.vmem [shape: f32[1,16], index: 5, kind: input, shape index: {}]   ;;  %s534_s4 = inlined_call_operand.vmem [shape: f32[32,16], index: 4, kind: input, shape index: {}]   ;;  %s535_s8 = inlined_call_operand.vmem [shape: f32[32,16], index: 8, kind: input, shape index: {}]   ;;  %s536_s9 = inlined_call_operand.vmem [shape: f32[1,16], index: 9, kind: input, shape index: {}]   ;;  %s537_s10 = inlined_call_operand.vmem [shape: f32[1,4,1], index: 10, kind: output, shape index: {}]  }
   0x1   :  { %v116_v0 = vld [vmem:[%s527_s6 + $0x18] sm:$0xff]  ;;  %v115_v1 = vld [vmem:[%s527_s6 + $0x10] sm:$0xff]  ;;  %v114_v4 = vld [vmem:[%s527_s6 + $0x8] sm:$0xff]  ;;  %vm255_vm4 = vcmask 1043459   ;;  %vm259_vm5 = vcmask 125952   ;;  %vm324_vm14 = vcmask 3072  }
   0x2   :  { %v39_v2 = vld [vmem:[%s528_s2 + $0x18] sm:$0xff]  ;;  %340 = vmatpush.msra.mxu2 %v116_v0  ;;  %v38_v3 = vld [vmem:[%s528_s2 + $0x10] sm:$0xff]  ;;  %v37_v5 = vld [vmem:[%s528_s2 + $0x8] sm:$0xff] }
   0x3   :  { %60 = vmatpush.msra.mxu0 %v39_v2  ;;  %v113_v6 = vld [vmem:[%s527_s6] sm:$0xff]  ;;  %v110_v8 = vld [vmem:[%s529_s1 + $0x8] sm:$0xff]  ;;  %v111_v10 = vld [vmem:[%s529_s1 + $0x10] sm:$0xff] }
   0x4   :  { %341 = vmatpush.msra.mxu2 %v115_v1  ;;  %v36_v7 = vld [vmem:[%s528_s2] sm:$0xff]  ;;  %v112_v12 = vld [vmem:[%s529_s1 + $0x18] sm:$0xff]  ;;  %v71_v14 = vld [vmem:[%s534_s4 + $0x10] sm:$0xff] }
   0x5   :  { %61 = vmatpush.msra.mxu0 %v38_v3  ;;  %v35_v9 = vld [vmem:[%s530_s0] sm:$0xff]  ;;  %v72_v13 = vld [vmem:[%s534_s4 + $0x18] sm:$0xff]  ;;  %v70_v16 = vld [vmem:[%s534_s4 + $0x8] sm:$0xff] }
   0x6   :  { %342 = vmatpush.msra.mxu2 %v114_v4  ;;  %v109_v11 = vld [vmem:[%s529_s1] sm:$0xff]  ;;  %92 = vmatpush.msra.mxu1 %v72_v13  ;;  %v169_v15 = vld [vmem:[%s535_s8 + $0x18] sm:$0xff]  ;;  %v168_v17 = vld [vmem:[%s535_s8 + $0x10] sm:$0xff] }
   0x7   :  { %62 = vmatpush.msra.mxu0 %v37_v5  ;;  %344 = vmatpush.msra.mxu3 %v169_v15  ;;  %v69_v18 = vld [vmem:[%s534_s4] sm:$0xff]  ;;  %v167_v19 = vld [vmem:[%s535_s8 + $0x8] sm:$0xff] }
   0x8   :  { %343 = vmatpush.msra.mxu2 %v113_v6  ;;  %93 = vmatpush.msra.mxu1 %v71_v14  ;;  %v166_v20 = vld [vmem:[%s535_s8] sm:$0xff] }
   0x9   :  { %63 = vmatpush.msra.mxu0 %v36_v7  ;;  %333 = vmatmul.msk.f32.vlgmr.msra.gmra.mxu2 %vm44_vm0, %v110_v8  ;;  %v348_v21 = vld [vmem:[%s531_s3] ss:$0 sm:$0xff] }
   0xa   :  { %330 = vmatmul.msk.f32.vlgmr.msra.gmra.mxu0 %vm44_vm0, %v35_v9  ;;  %94 = vmatpush.msra.mxu1 %v70_v16  ;;  %v349_v24 = vld [vmem:[%s532_s7] ss:$0 sm:$0xff] }
   0xb   :  { %145 = vmatpush.msrb.mxu0 %v116_v0  ;;  %345 = vmatpush.msra.mxu3 %v168_v17  ;;  %v351_v39 = vld [vmem:[%s536_s9] ss:$0 sm:$0xff] }
   0xc   :  { %95 = vmatpush.msra.mxu1 %v69_v18  ;;  %v350_v42 = vld [vmem:[%s533_s5] ss:$0 sm:$0xff] }
   0xd   :  { %146 = vmatpush.msrb.mxu0 %v115_v1  ;;  %346 = vmatpush.msra.mxu3 %v167_v19 }
   0xe   :  { %198 = vmatpush.msrb.mxu1 %v169_v15 }
   0xf   :  { %147 = vmatpush.msrb.mxu0 %v114_v4  ;;  %347 = vmatpush.msra.mxu3 %v166_v20 }
  0x10   :  { %199 = vmatpush.msrb.mxu1 %v168_v17 }
  0x11   :  { %148 = vmatpush.msrb.mxu0 %v113_v6  ;;  %334 = vmatmul.msk.f32.gmra.mxu2 %vm44_vm0, %v111_v10 }
  0x12   :  { %332 = vmatmul.msk.f32.vlgmr.msrb.gmra.mxu0 %vm44_vm0, %v109_v11  ;;  %200 = vmatpush.msrb.mxu1 %v167_v19 }
  0x14   :  { %201 = vmatpush.msrb.mxu1 %v166_v20 }
  0x19   :  { %335 = vmatmul.msk.f32.gmra.mxu2 %vm44_vm0, %v112_v12 }
  0x87   :  { %v65_v22 = vpop.f32.mrf.mxu0 }
  0x88   :  { %v66_v23 = vadd.f32 %v348_v21, %v65_v22 }
  0x8a   :  { %352 = vtanh.f32 %v66_v23 }
  0x8c   :  { %v153_v25 = vpop.f32.mrf.mxu2 }
  0x8d   :  { %v154_v26 = vadd.f32 %v349_v24, %v153_v25 }
  0x8f   :  { %v150_v27 = vpop.f32.mrf.mxu0  ;;  %354 = vtanh.f32 %v154_v26 }
  0x90   :  { %v353_v28 = vpop.eup %352  ;;  %v151_v29 = vadd.f32 %v349_v24, %v150_v27 }
  0x91   :  { %331 = vmatmul.msk.f32.vlgmr.msra.gmra.mxu1 %vm44_vm0, %v353_v28 }
  0x92   :  { %356 = vtanh.f32 %v151_v29 }
  0x94   :  { %v156_v30 = vpop.f32.mrf.mxu2 }
  0x95   :  { %v355_v31 = vpop.eup %354  ;;  %v157_v32 = vadd.f32 %v349_v24, %v156_v30 }
  0x96   :  { %337 = vmatmul.msk.f32.vlgmr.msra.gmra.mxu3 %vm44_vm0, %v355_v31 }
  0x97   :  { %358 = vtanh.f32 %v157_v32 }
  0x98   :  { %v357_v33 = vpop.eup %356 }
  0x99   :  { %336 = vmatmul.msk.f32.vlgmr.msrb.gmra.mxu1 %vm44_vm0, %v357_v33 }
  0x9c   :  { %v159_v34 = vpop.f32.mrf.mxu2 }
  0x9d   :  { %v359_v35 = vpop.eup %358  ;;  %v160_v36 = vadd.f32 %v349_v24, %v159_v34 }
  0x9e   :  { %338 = vmatmul.msk.f32.gmra.mxu3 %vm44_vm0, %v359_v35 }
  0x9f   :  { %360 = vtanh.f32 %v160_v36 }
  0xa5   :  { %v361_v37 = vpop.eup %360 }
  0xa6   :  { %339 = vmatmul.msk.f32.gmra.mxu3 %vm44_vm0, %v361_v37 }
 0x10e   :  { %v97_v38 = vpop.f32.mrf.mxu1 }
 0x10f   :  { %v98_v45 = vadd.f32 %v350_v42, %v97_v38 }
 0x116   :  { %v203_v40 = vpop.f32.mrf.mxu1 }
 0x117   :  { %v204_v41 = vadd.f32 %v351_v39, %v203_v40 }
 0x119   :  { %362 = vtanh.f32 %v204_v41  ;;  %v206_v43 = vpop.f32.mrf.mxu3 }
 0x11a   :  { %v207_v44 = vadd.f32 %v351_v39, %v206_v43 }
 0x11c   :  { %364 = vtanh.f32 %v207_v44 }
 0x11d   :  { %366 = vtanh.f32 %v98_v45 }
 0x11f   :  { %v363_v46 = vpop.eup %362 }
 0x120   :  { %v219_v47 = vsel %vm101_vm1, %v363_v46, -inf }
 0x121   :  { %v209_v48 = vpop.f32.mrf.mxu3  ;;  %v220_v52 = vrot.slane %v219_v47, 4 }
 0x122   :  { %v365_v49 = vpop.eup %364  ;;  %v210_v50 = vadd.f32 %v351_v39, %v209_v48 }
 0x123   :  { %v226_v51 = vsel %vm101_vm1, %v365_v49, -inf  ;;  %v367_v54 = vpop.eup %366  ;;  %v221_v56 = vmax.f32 %v219_v47, %v220_v52 }
 0x124   :  { %v227_v53 = vrot.slane %v226_v51, 4  ;;  %368 = vtanh.f32 %v210_v50  ;;  %v102_v55 = vsel %vm101_vm1, %v367_v54, -inf }
 0x125   :  { %v103_v61 = vrot.slane %v102_v55, 4  ;;  %v222_v63 = vrot.slane %v221_v56, 2 }
 0x126   :  { %v228_v57 = vmax.f32 %v226_v51, %v227_v53 }
 0x127   :  { %v104_v3 = vmax.f32 %v102_v55, %v103_v61  ;;  %v223_v4 = vmax.f32 %v221_v56, %v222_v63 }
 0x128   :  { %v229_v0 = vrot.slane %v228_v57, 2 }
 0x129   :  { %v212_v58 = vpop.f32.mrf.mxu3  ;;  %v105_v10 = vrot.slane %v104_v3, 2  ;;  %v224_v11 = vrot.slane %v223_v4, 1 }
 0x12a   :  { %v369_v59 = vpop.eup %368  ;;  %v213_v60 = vadd.f32 %v351_v39, %v212_v58  ;;  %v230_v5 = vmax.f32 %v228_v57, %v229_v0 }
 0x12b   :  { %v233_v62 = vsel %vm101_vm1, %v369_v59, -inf  ;;  %v106_v16 = vmax.f32 %v104_v3, %v105_v10  ;;  %v225_v18 = vmax.f32 %v223_v4, %v224_v11 }
 0x12c   :  { %v234_v1 = vrot.slane %v233_v62, 4  ;;  %370 = vtanh.f32 %v213_v60  ;;  %v231_v12 = vrot.slane %v230_v5, 1 }
 0x12d   :  { %v107_v22 = vrot.slane %v106_v16, 1  ;;  %v263_v24 = vmul.f32 %v225_v18, %v225_v18 }
 0x12e   :  { %v235_v2 = vmax.f32 %v233_v62, %v234_v1  ;;  %v232_v19 = vmax.f32 %v230_v5, %v231_v12 }
 0x12f   :  { %v108_v29 = vmax.f32 %v106_v16, %v107_v22 }
 0x130   :  { %v236_v6 = vrot.slane %v235_v2, 2  ;;  %v264_v25 = vmul.f32 %v232_v19, %v232_v19  ;;  %v252_v28 = vsel %vm251_vm2, %v232_v19, %v225_v18 }
 0x131   :  { %v290_v39 = vmul.f32 %v108_v29, %v108_v29 }
 0x132   :  { %v371_v7 = vpop.eup %370  ;;  %v237_v8 = vmax.f32 %v235_v2, %v236_v6  ;;  %v271_v32 = vsel %vm251_vm2, %v264_v25, %v263_v24 }
 0x133   :  { %v240_v9 = vsel %vm101_vm1, %v371_v7, -inf  ;;  %v291_v40 = vsel %vm101_vm1, %v290_v39, 0.0 }
 0x134   :  { %v241_v13 = vrot.slane %v240_v9, 4  ;;  %v238_v14 = vrot.slane %v237_v8, 1 }
 0x136   :  { %v242_v15 = vmax.f32 %v240_v9, %v241_v13  ;;  %v239_v20 = vmax.f32 %v237_v8, %v238_v14 }
 0x138   :  { %v243_v17 = vrot.slane %v242_v15, 2  ;;  %v265_v26 = vmul.f32 %v239_v20, %v239_v20  ;;  %v254_v30 = vsel %vm253_vm3, %v239_v20, %v252_v28 }
 0x13a   :  { %v244_v21 = vmax.f32 %v242_v15, %v243_v17  ;;  %v272_v34 = vsel %vm253_vm3, %v265_v26, %v271_v32 }
 0x13c   :  { %v245_v23 = vrot.slane %v244_v21, 1 }
 0x13e   :  { %v246_v27 = vmax.f32 %v244_v21, %v245_v23 }
 0x140   :  { %v266_v31 = vmul.f32 %v246_v27, %v246_v27  ;;  %v256_v33 = vsel %vm255_vm4, %v246_v27, %v254_v30 }
 0x141   :  { %v258_v35 = vmul.f32 %v256_v33, %v108_v29 }
 0x142   :  { %v273_v36 = vsel %vm255_vm4, %v266_v31, %v272_v34 }
 0x143   :  { %v275_v37 = vsel %vm259_vm5, %v273_v36, 0.0  ;;  %v260_v38 = vsel %vm259_vm5, %v258_v35, 0.0 }
 0x144   :  { %276 = vadd.xlane.f32.xlu0 %v275_v37  ;;  %261 = vadd.xlane.f32.xlu1 %v260_v38 }
 0x14c   :  { %292 = vadd.xlane.f32.xlu0 %v291_v40 }
 0x1b7   :  { %v277_v41 = vpop.xlane.xlu0 %276  ;;  %v262_v11 = vpop.xlane.xlu1 %261 }
 0x1b8   :  { %372 = vrsqrt.f32 %v277_v41  ;;  %vm285_vm6 = vcmp.eq.f32.partialorder %v277_v41, inf  ;;  %v288_v57 = vand.u32 2147483648, %v277_v41  ;;  %vm287_vm7 = vcmp.eq.f32.partialorder %v277_v41, 0.0 }
 0x1be   :  { %v373_v42 = vpop.eup %372 }
 0x1bf   :  { %v279_v43 = vmul.f32 %v373_v42, %v277_v41  ;;  %v293_v44 = vpop.xlane.xlu0 %292 }
 0x1c0   :  { %374 = vrsqrt.f32 %v293_v44  ;;  %vm301_vm8 = vcmp.eq.f32.partialorder %v293_v44, inf  ;;  %v304_v60 = vand.u32 2147483648, %v293_v44  ;;  %vm303_vm9 = vcmp.eq.f32.partialorder %v293_v44, 0.0 }
 0x1c1   :  { %v280_v45 = vmul.f32 %v373_v42, %v279_v43 }
 0x1c3   :  { %v281_v46 = vmul.f32 0.5, %v280_v45 }
 0x1c5   :  { %v282_v47 = vsub.f32 1.5, %v281_v46 }
 0x1c6   :  { %v375_v48 = vpop.eup %374 }
 0x1c7   :  { %v283_v49 = vmul.f32 %v373_v42, %v282_v47  ;;  %v295_v50 = vmul.f32 %v375_v48, %v293_v44 }
 0x1c9   :  { %v296_v51 = vmul.f32 %v375_v48, %v295_v50  ;;  %v284_v52 = vmul.f32 %v283_v49, %v277_v41 }
 0x1cb   :  { %v297_v53 = vmul.f32 0.5, %v296_v51  ;;  %v286_v55 = vsel %vm285_vm6, %v277_v41, %v284_v52 }
 0x1cc   :  { %v289_v59 = vsel %vm287_vm7, %v288_v57, %v286_v55 }
 0x1cd   :  { %v298_v54 = vsub.f32 1.5, %v297_v53  ;;  %v306_v63 = vmax.f32 %v289_v59, 1e-08 }
 0x1cf   :  { %v299_v56 = vmul.f32 %v375_v48, %v298_v54 }
 0x1d1   :  { %v300_v58 = vmul.f32 %v299_v56, %v293_v44 }
 0x1d3   :  { %v302_v61 = vsel %vm301_vm8, %v293_v44, %v300_v58 }
 0x1d4   :  { %v305_v62 = vsel %vm303_vm9, %v304_v60, %v302_v61 }
 0x1d5   :  { %v307_v0 = vmax.f32 %v305_v62, 1e-08 }
 0x1d7   :  { %v308_v1 = vmul.f32 %v307_v0, %v306_v63 }
 0x1d9   :  { %376 = vrcp.f32 %v308_v1  ;;  %v320_v5 = vand.u32 2147483648, %v308_v1  ;;  %v318_v7 = vand.u32 2147483647, %v308_v1  ;;  %vm314_vm11 = vweird.f32 %v308_v1 }
 0x1db   :  { %v321_v9 = vor.u32 1.1754944e-38, %v320_v5  ;;  %vm319_vm13 = vcmp.eq.f32.partialorder %v318_v7, 8.507059e+37 }
 0x1df   :  { %v377_v2 = vpop.eup %376 }
 0x1e0   :  { %v310_v3 = vmul.f32 %v377_v2, %v308_v1  ;;  %vm315_vm10 = vweird.f32 %v377_v2 }
 0x1e1   :  { %vm316_vm12 = vmor %vm314_vm11, %vm315_vm10 }
 0x1e2   :  { %v311_v4 = vsub.f32 1.0, %v310_v3 }
 0x1e4   :  { %v312_v6 = vmul.f32 %v377_v2, %v311_v4 }
 0x1e6   :  { %v313_v8 = vadd.f32 %v377_v2, %v312_v6 }
 0x1e8   :  { %v317_v10 = vsel %vm316_vm12, %v377_v2, %v313_v8 }
 0x1e9   :  { %v322_v12 = vsel %vm319_vm13, %v321_v9, %v317_v10 }
 0x1ea   :  { %v323_v13 = vmul.f32 %v322_v12, %v262_v11 }
 0x1ec   :  { %325 = vst.msk [vmem:[%s537_s10] sm:$0xf] %vm324_vm14, %v323_v13 }

</bundles_post_ra>
